<compile_context>
chip_gen: v5e
topology: v5e:2x2
jax: 0.10.0
libtpu: 0.0.40
codegen_flags: <defaults>
</compile_context>

<pallas_src>
import functools

import jax
import jax.numpy as jnp
from jax import lax
from jax.experimental import pallas as pl
from jax.experimental.pallas import tpu as pltpu

NUM_VALS = 64                 # codebook size
LANE_W = 1024                 # preferred lane-dense slab width (multiple of 128)
CHUNK_ELEMS = 8 * 1024        # inner strip-mine chunk: 8 f32 vregs
MAX_BLOCK_ELEMS = 256 * 1024  # ~1 MiB f32 per grid block (x in/out, x dbl-buf ≈ 4 MiB VMEM)


def _round_up(a, b):
    return -(-a // b) * b


def _fp6_leaky_relu_kernel(vals_ref, mids_ref, x_ref, o_ref, *,
                           negative_slope, chunk_rows):
    # vals_ref: f32[64] in SMEM (sorted codebook)
    # mids_ref: f32[63] in SMEM (midpoints (vals[j]+vals[j+1])/2)
    # x_ref / o_ref: (tr, W) tiles in VMEM (native model dtype)

    def _quantize(x):
        x = x.astype(jnp.float32)
        # LeakyReLU: x if x >= 0 else negative_slope * x
        y = jnp.where(x >= 0, x, negative_slope * x)
        # Nearest codebook value, ties to the lower value: strict compare against
        # the midpoint keeps y == mid on the lower value, matching the reference's
        # "dist_low <= dist_high -> low" rule. Emits exact codebook entries.
        out = jnp.full(y.shape, vals_ref[0], dtype=jnp.float32)
        for j in range(NUM_VALS - 1):
            out = jnp.where(y > mids_ref[j], vals_ref[j + 1], out)
        return out.astype(o_ref.dtype)

    nrows = x_ref.shape[0]
    if nrows > chunk_rows and nrows % chunk_rows == 0:
        # Strip-mine the block: the 63-boundary chain runs on an ~8-vreg chunk so
        # y/out stay in registers (no VMEM round-trips / spills on the unrolled chain).
        def body(i, carry):
            r = pl.multiple_of(i * chunk_rows, chunk_rows)
            o_ref[pl.ds(r, chunk_rows), :] = _quantize(x_ref[pl.ds(r, chunk_rows), :])
            return carry

        lax.fori_loop(0, nrows // chunk_rows, body, 0)
    else:
        # Small block (<= one chunk): process it whole.
        o_ref[...] = _quantize(x_ref[...])


def _choose_width(n):
    """Pick a lane-dense width that divides n (copy-free path) or fall back to padding."""
    for w in (1024, 512, 256, 128):
        if n % w == 0:
            return w, 0
    return LANE_W, (-n) % LANE_W


def _choose_tile(rows, chunk_rows, w):
    if rows <= chunk_rows:
        return rows, 1
    max_tr = max(chunk_rows, (MAX_BLOCK_ELEMS // w) // chunk_rows * chunk_rows)
    # Aim for >=2 grid steps so dimension_semantics=("parallel",) actually splits
    # the rows across v7x's two TensorCores.
    tr = min(max_tr, _round_up(-(-rows // 2), chunk_rows))
    return tr, -(-rows // tr)


def fp6_leaky_relu(x, fp6_values, negative_slope=0.01):
    """Forward pass of FP6LeakyReLU. x: any shape (e.g. NCHW), fp6_values: f32[64]."""
    orig_shape = x.shape
    n = x.size
    if n == 0:
        return x

    # The module sorts the learnable codebook every forward call; do it, plus the
    # midpoint table, in glue JAX (64 scalars - negligible).
    vals = jnp.sort(fp6_values.astype(jnp.float32))
    mids = 0.5 * (vals[:-1] + vals[1:])

    w, pad = _choose_width(n)
    flat = x.reshape(-1)
    if pad:
        # TODO(synk): a 1-D ragged-last-block path would remove this pad/slice copy
        # for sizes not divisible by 128; common NN activation sizes take the
        # copy-free branch above.
        flat = jnp.pad(flat, (0, pad))
    rows = flat.shape[0] // w
    x2d = flat.reshape(rows, w)

    chunk_rows = max(1, CHUNK_ELEMS // w)
    tr, num_blocks = _choose_tile(rows, chunk_rows, w)

    kernel = functools.partial(_fp6_leaky_relu_kernel,
                               negative_slope=float(negative_slope),
                               chunk_rows=chunk_rows)

    # TODO(synk): optional bf16 in-kernel compute (v6e/v7x, ~2x VALU throughput) and
    # an exponent/mantissa bit-math fast path for the frozen canonical FP6 grid; both
    # can flip midpoint ties vs the f32 torch reference, so the exact f32
    # compare/select chain stays the default.
    out2d = pl.pallas_call(
        kernel,
        out_shape=jax.ShapeDtypeStruct((rows, w), x.dtype),
        grid=(num_blocks,),
        in_specs=[
            pl.BlockSpec(memory_space=pltpu.MemorySpace.SMEM),   # vals[64]
            pl.BlockSpec(memory_space=pltpu.MemorySpace.SMEM),   # mids[63]
            pl.BlockSpec((tr, w), lambda i: (i, 0)),             # activation tile
        ],
        out_specs=pl.BlockSpec((tr, w), lambda i: (i, 0)),
        compiler_params=pltpu.CompilerParams(
            dimension_semantics=("parallel",)),
    )(vals, mids, x2d)

    out = out2d.reshape(-1)
    if pad:
        out = out[:n]
    return out.reshape(orig_shape)


def _init_fp6_values():
    init_vals = [0.0, 0.0625, 0.125, 0.1875, 0.25, 0.3125, 0.375, 0.4375, 0.5,
                 0.625, 0.75, 0.875, 1.0, 1.25, 1.5, 1.75, 2.0, 2.5, 3.0, 3.5,
                 4.0, 5.0, 6.0, 7.0, 8.0, 10.0, 12.0, 14.0, 16.0, 20.0, 24.0,
                 28.0, -0.0625, -0.125, -0.1875, -0.25, -0.3125, -0.375,
                 -0.4375, -0.5, -0.625, -0.75, -0.875, -1.0, -1.25, -1.5,
                 -1.75, -2.0, -2.5, -3.0, -3.5, -4.0, -5.0, -6.0, -7.0, -8.0,
                 -10.0, -12.0, -14.0, -16.0, -20.0, -24.0, -28.0, -32.0]
    vals = sorted(set(init_vals))[:NUM_VALS]
    return jnp.asarray(vals, dtype=jnp.float32)


def _reference(x, fp6_values, negative_slope=0.01):
    # Pure-JAX reference mirroring the PyTorch semantics exactly.
    vals = jnp.sort(fp6_values)
    y = jnp.where(x >= 0, x, negative_slope * x)
    idx = jnp.searchsorted(vals, y, side="left")
    idx = jnp.clip(idx, 1, NUM_VALS - 1)
    high = vals[idx]
    low = vals[idx - 1]
    return jnp.where(jnp.abs(y - low) <= jnp.abs(y - high), low, high)


if __name__ == "__main__":
    key = jax.random.PRNGKey(0)
    fp6_values = _init_fp6_values()   # deterministic parameter init (module __init__)

    shapes = [
        (2, 4, 16, 16),   # canonical NCHW demo: aligned, single block
        (4, 8, 32, 32),   # multi-block grid + in-kernel strip-mined chunks
        (3, 5, 7, 9),     # odd tail: pad/slice fallback path
    ]
    keys = jax.random.split(key, len(shapes))
    for k, shp in zip(keys, shapes):
        x = jax.random.normal(k, shp, dtype=jnp.float32) * 8.0
        out = jax.block_until_ready(fp6_leaky_relu(x, fp6_values, negative_slope=0.01))
        ref = _reference(x, fp6_values, negative_slope=0.01)
        assert out.shape == x.shape and out.dtype == x.dtype
        assert bool(jnp.array_equal(out, ref)), f"mismatch vs reference for shape {shp}"

    print("KERNEL_OK")
</pallas_src>

<mosaic_0001>
module attributes {stable_mosaic.version = 11 : i64} {
  func.func @_fp6_leaky_relu_kernel(%arg0: i32, %arg1: memref<64xf32, #tpu.memory_space<smem>>, %arg2: memref<63xf32, #tpu.memory_space<smem>>, %arg3: memref<2x1024xf32, #tpu.memory_space<vmem>>, %arg4: memref<2x1024xf32, #tpu.memory_space<vmem>>) attributes {dimension_semantics = [#tpu.dimension_semantics<parallel>], iteration_bounds = array<i64: 1>, scalar_prefetch = 0 : i64, scratch_operands = 0 : i64, tpu.core_type = #tpu.core_type<tc>, window_params = [{transform_indices = @transform_0, window_bounds = array<i64: 64>}, {transform_indices = @transform_1, window_bounds = array<i64: 63>}, {transform_indices = @transform_2, window_bounds = array<i64: 2, 1024>}, {transform_indices = @transform_3, window_bounds = array<i64: 2, 1024>}]} {
    %c0 = arith.constant 0 : index
    %c0_0 = arith.constant 0 : index
    %0 = vector.load %arg3[%c0, %c0_0] : memref<2x1024xf32, #tpu.memory_space<vmem>>, vector<2x1024xf32>
    %cst = arith.constant 0.000000e+00 : f32
    %1 = vector.broadcast %cst : f32 to vector<2x1024xf32>
    %2 = arith.cmpf oge, %0, %1 : vector<2x1024xf32>
    %cst_1 = arith.constant 0.00999999977 : f32
    %3 = vector.broadcast %cst_1 : f32 to vector<2x1024xf32>
    %4 = arith.mulf %3, %0 : vector<2x1024xf32>
    %5 = arith.select %2, %0, %4 : vector<2x1024xi1>, vector<2x1024xf32>
    %c0_2 = arith.constant 0 : index
    %6 = memref.load %arg1[%c0_2] : memref<64xf32, #tpu.memory_space<smem>>
    %7 = vector.broadcast %6 : f32 to vector<2x1024xf32>
    %c0_3 = arith.constant 0 : index
    %8 = memref.load %arg2[%c0_3] : memref<63xf32, #tpu.memory_space<smem>>
    %9 = vector.broadcast %8 : f32 to vector<2x1024xf32>
    %10 = arith.cmpf ogt, %5, %9 : vector<2x1024xf32>
    %c1 = arith.constant 1 : index
    %11 = memref.load %arg1[%c1] : memref<64xf32, #tpu.memory_space<smem>>
    %12 = vector.broadcast %11 : f32 to vector<2x1024xf32>
    %13 = arith.select %10, %12, %7 : vector<2x1024xi1>, vector<2x1024xf32>
    %c1_4 = arith.constant 1 : index
    %14 = memref.load %arg2[%c1_4] : memref<63xf32, #tpu.memory_space<smem>>
    %15 = vector.broadcast %14 : f32 to vector<2x1024xf32>
    %16 = arith.cmpf ogt, %5, %15 : vector<2x1024xf32>
    %c2 = arith.constant 2 : index
    %17 = memref.load %arg1[%c2] : memref<64xf32, #tpu.memory_space<smem>>
    %18 = vector.broadcast %17 : f32 to vector<2x1024xf32>
    %19 = arith.select %16, %18, %13 : vector<2x1024xi1>, vector<2x1024xf32>
    %c2_5 = arith.constant 2 : index
    %20 = memref.load %arg2[%c2_5] : memref<63xf32, #tpu.memory_space<smem>>
    %21 = vector.broadcast %20 : f32 to vector<2x1024xf32>
    %22 = arith.cmpf ogt, %5, %21 : vector<2x1024xf32>
    %c3 = arith.constant 3 : index
    %23 = memref.load %arg1[%c3] : memref<64xf32, #tpu.memory_space<smem>>
    %24 = vector.broadcast %23 : f32 to vector<2x1024xf32>
    %25 = arith.select %22, %24, %19 : vector<2x1024xi1>, vector<2x1024xf32>
    %c3_6 = arith.constant 3 : index
    %26 = memref.load %arg2[%c3_6] : memref<63xf32, #tpu.memory_space<smem>>
    %27 = vector.broadcast %26 : f32 to vector<2x1024xf32>
    %28 = arith.cmpf ogt, %5, %27 : vector<2x1024xf32>
    %c4 = arith.constant 4 : index
    %29 = memref.load %arg1[%c4] : memref<64xf32, #tpu.memory_space<smem>>
    %30 = vector.broadcast %29 : f32 to vector<2x1024xf32>
    %31 = arith.select %28, %30, %25 : vector<2x1024xi1>, vector<2x1024xf32>
    %c4_7 = arith.constant 4 : index
    %32 = memref.load %arg2[%c4_7] : memref<63xf32, #tpu.memory_space<smem>>
    %33 = vector.broadcast %32 : f32 to vector<2x1024xf32>
    %34 = arith.cmpf ogt, %5, %33 : vector<2x1024xf32>
    %c5 = arith.constant 5 : index
    %35 = memref.load %arg1[%c5] : memref<64xf32, #tpu.memory_space<smem>>
    %36 = vector.broadcast %35 : f32 to vector<2x1024xf32>
    %37 = arith.select %34, %36, %31 : vector<2x1024xi1>, vector<2x1024xf32>
    %c5_8 = arith.constant 5 : index
    %38 = memref.load %arg2[%c5_8] : memref<63xf32, #tpu.memory_space<smem>>
    %39 = vector.broadcast %38 : f32 to vector<2x1024xf32>
    %40 = arith.cmpf ogt, %5, %39 : vector<2x1024xf32>
    %c6 = arith.constant 6 : index
    %41 = memref.load %arg1[%c6] : memref<64xf32, #tpu.memory_space<smem>>
    %42 = vector.broadcast %41 : f32 to vector<2x1024xf32>
    %43 = arith.select %40, %42, %37 : vector<2x1024xi1>, vector<2x1024xf32>
    %c6_9 = arith.constant 6 : index
    %44 = memref.load %arg2[%c6_9] : memref<63xf32, #tpu.memory_space<smem>>
    %45 = vector.broadcast %44 : f32 to vector<2x1024xf32>
    %46 = arith.cmpf ogt, %5, %45 : vector<2x1024xf32>
    %c7 = arith.constant 7 : index
    %47 = memref.load %arg1[%c7] : memref<64xf32, #tpu.memory_space<smem>>
    %48 = vector.broadcast %47 : f32 to vector<2x1024xf32>
    %49 = arith.select %46, %48, %43 : vector<2x1024xi1>, vector<2x1024xf32>
    %c7_10 = arith.constant 7 : index
    %50 = memref.load %arg2[%c7_10] : memref<63xf32, #tpu.memory_space<smem>>
    %51 = vector.broadcast %50 : f32 to vector<2x1024xf32>
    %52 = arith.cmpf ogt, %5, %51 : vector<2x1024xf32>
    %c8 = arith.constant 8 : index
    %53 = memref.load %arg1[%c8] : memref<64xf32, #tpu.memory_space<smem>>
    %54 = vector.broadcast %53 : f32 to vector<2x1024xf32>
    %55 = arith.select %52, %54, %49 : vector<2x1024xi1>, vector<2x1024xf32>
    %c8_11 = arith.constant 8 : index
    %56 = memref.load %arg2[%c8_11] : memref<63xf32, #tpu.memory_space<smem>>
    %57 = vector.broadcast %56 : f32 to vector<2x1024xf32>
    %58 = arith.cmpf ogt, %5, %57 : vector<2x1024xf32>
    %c9 = arith.constant 9 : index
    %59 = memref.load %arg1[%c9] : memref<64xf32, #tpu.memory_space<smem>>
    %60 = vector.broadcast %59 : f32 to vector<2x1024xf32>
    %61 = arith.select %58, %60, %55 : vector<2x1024xi1>, vector<2x1024xf32>
    %c9_12 = arith.constant 9 : index
    %62 = memref.load %arg2[%c9_12] : memref<63xf32, #tpu.memory_space<smem>>
    %63 = vector.broadcast %62 : f32 to vector<2x1024xf32>
    %64 = arith.cmpf ogt, %5, %63 : vector<2x1024xf32>
    %c10 = arith.constant 10 : index
    %65 = memref.load %arg1[%c10] : memref<64xf32, #tpu.memory_space<smem>>
    %66 = vector.broadcast %65 : f32 to vector<2x1024xf32>
    %67 = arith.select %64, %66, %61 : vector<2x1024xi1>, vector<2x1024xf32>
    %c10_13 = arith.constant 10 : index
    %68 = memref.load %arg2[%c10_13] : memref<63xf32, #tpu.memory_space<smem>>
    %69 = vector.broadcast %68 : f32 to vector<2x1024xf32>
    %70 = arith.cmpf ogt, %5, %69 : vector<2x1024xf32>
    %c11 = arith.constant 11 : index
    %71 = memref.load %arg1[%c11] : memref<64xf32, #tpu.memory_space<smem>>
    %72 = vector.broadcast %71 : f32 to vector<2x1024xf32>
    %73 = arith.select %70, %72, %67 : vector<2x1024xi1>, vector<2x1024xf32>
    %c11_14 = arith.constant 11 : index
    %74 = memref.load %arg2[%c11_14] : memref<63xf32, #tpu.memory_space<smem>>
    %75 = vector.broadcast %74 : f32 to vector<2x1024xf32>
    %76 = arith.cmpf ogt, %5, %75 : vector<2x1024xf32>
    %c12 = arith.constant 12 : index
    %77 = memref.load %arg1[%c12] : memref<64xf32, #tpu.memory_space<smem>>
    %78 = vector.broadcast %77 : f32 to vector<2x1024xf32>
    %79 = arith.select %76, %78, %73 : vector<2x1024xi1>, vector<2x1024xf32>
    %c12_15 = arith.constant 12 : index
    %80 = memref.load %arg2[%c12_15] : memref<63xf32, #tpu.memory_space<smem>>
    %81 = vector.broadcast %80 : f32 to vector<2x1024xf32>
    %82 = arith.cmpf ogt, %5, %81 : vector<2x1024xf32>
    %c13 = arith.constant 13 : index
    %83 = memref.load %arg1[%c13] : memref<64xf32, #tpu.memory_space<smem>>
    %84 = vector.broadcast %83 : f32 to vector<2x1024xf32>
    %85 = arith.select %82, %84, %79 : vector<2x1024xi1>, vector<2x1024xf32>
    %c13_16 = arith.constant 13 : index
    %86 = memref.load %arg2[%c13_16] : memref<63xf32, #tpu.memory_space<smem>>
    %87 = vector.broadcast %86 : f32 to vector<2x1024xf32>
    %88 = arith.cmpf ogt, %5, %87 : vector<2x1024xf32>
    %c14 = arith.constant 14 : index
    %89 = memref.load %arg1[%c14] : memref<64xf32, #tpu.memory_space<smem>>
    %90 = vector.broadcast %89 : f32 to vector<2x1024xf32>
    %91 = arith.select %88, %90, %85 : vector<2x1024xi1>, vector<2x1024xf32>
    %c14_17 = arith.constant 14 : index
    %92 = memref.load %arg2[%c14_17] : memref<63xf32, #tpu.memory_space<smem>>
    %93 = vector.broadcast %92 : f32 to vector<2x1024xf32>
    %94 = arith.cmpf ogt, %5, %93 : vector<2x1024xf32>
    %c15 = arith.constant 15 : index
    %95 = memref.load %arg1[%c15] : memref<64xf32, #tpu.memory_space<smem>>
    %96 = vector.broadcast %95 : f32 to vector<2x1024xf32>
    %97 = arith.select %94, %96, %91 : vector<2x1024xi1>, vector<2x1024xf32>
    %c15_18 = arith.constant 15 : index
    %98 = memref.load %arg2[%c15_18] : memref<63xf32, #tpu.memory_space<smem>>
    %99 = vector.broadcast %98 : f32 to vector<2x1024xf32>
    %100 = arith.cmpf ogt, %5, %99 : vector<2x1024xf32>
    %c16 = arith.constant 16 : index
    %101 = memref.load %arg1[%c16] : memref<64xf32, #tpu.memory_space<smem>>
    %102 = vector.broadcast %101 : f32 to vector<2x1024xf32>
    %103 = arith.select %100, %102, %97 : vector<2x1024xi1>, vector<2x1024xf32>
    %c16_19 = arith.constant 16 : index
    %104 = memref.load %arg2[%c16_19] : memref<63xf32, #tpu.memory_space<smem>>
    %105 = vector.broadcast %104 : f32 to vector<2x1024xf32>
    %106 = arith.cmpf ogt, %5, %105 : vector<2x1024xf32>
    %c17 = arith.constant 17 : index
    %107 = memref.load %arg1[%c17] : memref<64xf32, #tpu.memory_space<smem>>
    %108 = vector.broadcast %107 : f32 to vector<2x1024xf32>
    %109 = arith.select %106, %108, %103 : vector<2x1024xi1>, vector<2x1024xf32>
    %c17_20 = arith.constant 17 : index
    %110 = memref.load %arg2[%c17_20] : memref<63xf32, #tpu.memory_space<smem>>
    %111 = vector.broadcast %110 : f32 to vector<2x1024xf32>
    %112 = arith.cmpf ogt, %5, %111 : vector<2x1024xf32>
    %c18 = arith.constant 18 : index
    %113 = memref.load %arg1[%c18] : memref<64xf32, #tpu.memory_space<smem>>
    %114 = vector.broadcast %113 : f32 to vector<2x1024xf32>
    %115 = arith.select %112, %114, %109 : vector<2x1024xi1>, vector<2x1024xf32>
    %c18_21 = arith.constant 18 : index
    %116 = memref.load %arg2[%c18_21] : memref<63xf32, #tpu.memory_space<smem>>
    %117 = vector.broadcast %116 : f32 to vector<2x1024xf32>
    %118 = arith.cmpf ogt, %5, %117 : vector<2x1024xf32>
    %c19 = arith.constant 19 : index
    %119 = memref.load %arg1[%c19] : memref<64xf32, #tpu.memory_space<smem>>
    %120 = vector.broadcast %119 : f32 to vector<2x1024xf32>
    %121 = arith.select %118, %120, %115 : vector<2x1024xi1>, vector<2x1024xf32>
    %c19_22 = arith.constant 19 : index
    %122 = memref.load %arg2[%c19_22] : memref<63xf32, #tpu.memory_space<smem>>
    %123 = vector.broadcast %122 : f32 to vector<2x1024xf32>
    %124 = arith.cmpf ogt, %5, %123 : vector<2x1024xf32>
    %c20 = arith.constant 20 : index
    %125 = memref.load %arg1[%c20] : memref<64xf32, #tpu.memory_space<smem>>
    %126 = vector.broadcast %125 : f32 to vector<2x1024xf32>
    %127 = arith.select %124, %126, %121 : vector<2x1024xi1>, vector<2x1024xf32>
    %c20_23 = arith.constant 20 : index
    %128 = memref.load %arg2[%c20_23] : memref<63xf32, #tpu.memory_space<smem>>
    %129 = vector.broadcast %128 : f32 to vector<2x1024xf32>
    %130 = arith.cmpf ogt, %5, %129 : vector<2x1024xf32>
    %c21 = arith.constant 21 : index
    %131 = memref.load %arg1[%c21] : memref<64xf32, #tpu.memory_space<smem>>
    %132 = vector.broadcast %131 : f32 to vector<2x1024xf32>
    %133 = arith.select %130, %132, %127 : vector<2x1024xi1>, vector<2x1024xf32>
    %c21_24 = arith.constant 21 : index
    %134 = memref.load %arg2[%c21_24] : memref<63xf32, #tpu.memory_space<smem>>
    %135 = vector.broadcast %134 : f32 to vector<2x1024xf32>
    %136 = arith.cmpf ogt, %5, %135 : vector<2x1024xf32>
    %c22 = arith.constant 22 : index
    %137 = memref.load %arg1[%c22] : memref<64xf32, #tpu.memory_space<smem>>
    %138 = vector.broadcast %137 : f32 to vector<2x1024xf32>
    %139 = arith.select %136, %138, %133 : vector<2x1024xi1>, vector<2x1024xf32>
    %c22_25 = arith.constant 22 : index
    %140 = memref.load %arg2[%c22_25] : memref<63xf32, #tpu.memory_space<smem>>
    %141 = vector.broadcast %140 : f32 to vector<2x1024xf32>
    %142 = arith.cmpf ogt, %5, %141 : vector<2x1024xf32>
    %c23 = arith.constant 23 : index
    %143 = memref.load %arg1[%c23] : memref<64xf32, #tpu.memory_space<smem>>
    %144 = vector.broadcast %143 : f32 to vector<2x1024xf32>
    %145 = arith.select %142, %144, %139 : vector<2x1024xi1>, vector<2x1024xf32>
    %c23_26 = arith.constant 23 : index
    %146 = memref.load %arg2[%c23_26] : memref<63xf32, #tpu.memory_space<smem>>
    %147 = vector.broadcast %146 : f32 to vector<2x1024xf32>
    %148 = arith.cmpf ogt, %5, %147 : vector<2x1024xf32>
    %c24 = arith.constant 24 : index
    %149 = memref.load %arg1[%c24] : memref<64xf32, #tpu.memory_space<smem>>
    %150 = vector.broadcast %149 : f32 to vector<2x1024xf32>
    %151 = arith.select %148, %150, %145 : vector<2x1024xi1>, vector<2x1024xf32>
    %c24_27 = arith.constant 24 : index
    %152 = memref.load %arg2[%c24_27] : memref<63xf32, #tpu.memory_space<smem>>
    %153 = vector.broadcast %152 : f32 to vector<2x1024xf32>
    %154 = arith.cmpf ogt, %5, %153 : vector<2x1024xf32>
    %c25 = arith.constant 25 : index
    %155 = memref.load %arg1[%c25] : memref<64xf32, #tpu.memory_space<smem>>
    %156 = vector.broadcast %155 : f32 to vector<2x1024xf32>
    %157 = arith.select %154, %156, %151 : vector<2x1024xi1>, vector<2x1024xf32>
    %c25_28 = arith.constant 25 : index
    %158 = memref.load %arg2[%c25_28] : memref<63xf32, #tpu.memory_space<smem>>
    %159 = vector.broadcast %158 : f32 to vector<2x1024xf32>
    %160 = arith.cmpf ogt, %5, %159 : vector<2x1024xf32>
    %c26 = arith.constant 26 : index
    %161 = memref.load %arg1[%c26] : memref<64xf32, #tpu.memory_space<smem>>
    %162 = vector.broadcast %161 : f32 to vector<2x1024xf32>
    %163 = arith.select %160, %162, %157 : vector<2x1024xi1>, vector<2x1024xf32>
    %c26_29 = arith.constant 26 : index
    %164 = memref.load %arg2[%c26_29] : memref<63xf32, #tpu.memory_space<smem>>
    %165 = vector.broadcast %164 : f32 to vector<2x1024xf32>
    %166 = arith.cmpf ogt, %5, %165 : vector<2x1024xf32>
    %c27 = arith.constant 27 : index
    %167 = memref.load %arg1[%c27] : memref<64xf32, #tpu.memory_space<smem>>
    %168 = vector.broadcast %167 : f32 to vector<2x1024xf32>
    %169 = arith.select %166, %168, %163 : vector<2x1024xi1>, vector<2x1024xf32>
    %c27_30 = arith.constant 27 : index
    %170 = memref.load %arg2[%c27_30] : memref<63xf32, #tpu.memory_space<smem>>
    %171 = vector.broadcast %170 : f32 to vector<2x1024xf32>
    %172 = arith.cmpf ogt, %5, %171 : vector<2x1024xf32>
    %c28 = arith.constant 28 : index
    %173 = memref.load %arg1[%c28] : memref<64xf32, #tpu.memory_space<smem>>
    %174 = vector.broadcast %173 : f32 to vector<2x1024xf32>
    %175 = arith.select %172, %174, %169 : vector<2x1024xi1>, vector<2x1024xf32>
    %c28_31 = arith.constant 28 : index
    %176 = memref.load %arg2[%c28_31] : memref<63xf32, #tpu.memory_space<smem>>
    %177 = vector.broadcast %176 : f32 to vector<2x1024xf32>
    %178 = arith.cmpf ogt, %5, %177 : vector<2x1024xf32>
    %c29 = arith.constant 29 : index
    %179 = memref.load %arg1[%c29] : memref<64xf32, #tpu.memory_space<smem>>
    %180 = vector.broadcast %179 : f32 to vector<2x1024xf32>
    %181 = arith.select %178, %180, %175 : vector<2x1024xi1>, vector<2x1024xf32>
    %c29_32 = arith.constant 29 : index
    %182 = memref.load %arg2[%c29_32] : memref<63xf32, #tpu.memory_space<smem>>
    %183 = vector.broadcast %182 : f32 to vector<2x1024xf32>
    %184 = arith.cmpf ogt, %5, %183 : vector<2x1024xf32>
    %c30 = arith.constant 30 : index
    %185 = memref.load %arg1[%c30] : memref<64xf32, #tpu.memory_space<smem>>
    %186 = vector.broadcast %185 : f32 to vector<2x1024xf32>
    %187 = arith.select %184, %186, %181 : vector<2x1024xi1>, vector<2x1024xf32>
    %c30_33 = arith.constant 30 : index
    %188 = memref.load %arg2[%c30_33] : memref<63xf32, #tpu.memory_space<smem>>
    %189 = vector.broadcast %188 : f32 to vector<2x1024xf32>
    %190 = arith.cmpf ogt, %5, %189 : vector<2x1024xf32>
    %c31 = arith.constant 31 : index
    %191 = memref.load %arg1[%c31] : memref<64xf32, #tpu.memory_space<smem>>
    %192 = vector.broadcast %191 : f32 to vector<2x1024xf32>
    %193 = arith.select %190, %192, %187 : vector<2x1024xi1>, vector<2x1024xf32>
    %c31_34 = arith.constant 31 : index
    %194 = memref.load %arg2[%c31_34] : memref<63xf32, #tpu.memory_space<smem>>
    %195 = vector.broadcast %194 : f32 to vector<2x1024xf32>
    %196 = arith.cmpf ogt, %5, %195 : vector<2x1024xf32>
    %c32 = arith.constant 32 : index
    %197 = memref.load %arg1[%c32] : memref<64xf32, #tpu.memory_space<smem>>
    %198 = vector.broadcast %197 : f32 to vector<2x1024xf32>
    %199 = arith.select %196, %198, %193 : vector<2x1024xi1>, vector<2x1024xf32>
    %c32_35 = arith.constant 32 : index
    %200 = memref.load %arg2[%c32_35] : memref<63xf32, #tpu.memory_space<smem>>
    %201 = vector.broadcast %200 : f32 to vector<2x1024xf32>
    %202 = arith.cmpf ogt, %5, %201 : vector<2x1024xf32>
    %c33 = arith.constant 33 : index
    %203 = memref.load %arg1[%c33] : memref<64xf32, #tpu.memory_space<smem>>
    %204 = vector.broadcast %203 : f32 to vector<2x1024xf32>
    %205 = arith.select %202, %204, %199 : vector<2x1024xi1>, vector<2x1024xf32>
    %c33_36 = arith.constant 33 : index
    %206 = memref.load %arg2[%c33_36] : memref<63xf32, #tpu.memory_space<smem>>
    %207 = vector.broadcast %206 : f32 to vector<2x1024xf32>
    %208 = arith.cmpf ogt, %5, %207 : vector<2x1024xf32>
    %c34 = arith.constant 34 : index
    %209 = memref.load %arg1[%c34] : memref<64xf32, #tpu.memory_space<smem>>
    %210 = vector.broadcast %209 : f32 to vector<2x1024xf32>
    %211 = arith.select %208, %210, %205 : vector<2x1024xi1>, vector<2x1024xf32>
    %c34_37 = arith.constant 34 : index
    %212 = memref.load %arg2[%c34_37] : memref<63xf32, #tpu.memory_space<smem>>
    %213 = vector.broadcast %212 : f32 to vector<2x1024xf32>
    %214 = arith.cmpf ogt, %5, %213 : vector<2x1024xf32>
    %c35 = arith.constant 35 : index
    %215 = memref.load %arg1[%c35] : memref<64xf32, #tpu.memory_space<smem>>
    %216 = vector.broadcast %215 : f32 to vector<2x1024xf32>
    %217 = arith.select %214, %216, %211 : vector<2x1024xi1>, vector<2x1024xf32>
    %c35_38 = arith.constant 35 : index
    %218 = memref.load %arg2[%c35_38] : memref<63xf32, #tpu.memory_space<smem>>
    %219 = vector.broadcast %218 : f32 to vector<2x1024xf32>
    %220 = arith.cmpf ogt, %5, %219 : vector<2x1024xf32>
    %c36 = arith.constant 36 : index
    %221 = memref.load %arg1[%c36] : memref<64xf32, #tpu.memory_space<smem>>
    %222 = vector.broadcast %221 : f32 to vector<2x1024xf32>
    %223 = arith.select %220, %222, %217 : vector<2x1024xi1>, vector<2x1024xf32>
    %c36_39 = arith.constant 36 : index
    %224 = memref.load %arg2[%c36_39] : memref<63xf32, #tpu.memory_space<smem>>
    %225 = vector.broadcast %224 : f32 to vector<2x1024xf32>
    %226 = arith.cmpf ogt, %5, %225 : vector<2x1024xf32>
    %c37 = arith.constant 37 : index
    %227 = memref.load %arg1[%c37] : memref<64xf32, #tpu.memory_space<smem>>
    %228 = vector.broadcast %227 : f32 to vector<2x1024xf32>
    %229 = arith.select %226, %228, %223 : vector<2x1024xi1>, vector<2x1024xf32>
    %c37_40 = arith.constant 37 : index
    %230 = memref.load %arg2[%c37_40] : memref<63xf32, #tpu.memory_space<smem>>
    %231 = vector.broadcast %230 : f32 to vector<2x1024xf32>
    %232 = arith.cmpf ogt, %5, %231 : vector<2x1024xf32>
    %c38 = arith.constant 38 : index
    %233 = memref.load %arg1[%c38] : memref<64xf32, #tpu.memory_space<smem>>
    %234 = vector.broadcast %233 : f32 to vector<2x1024xf32>
    %235 = arith.select %232, %234, %229 : vector<2x1024xi1>, vector<2x1024xf32>
    %c38_41 = arith.constant 38 : index
    %236 = memref.load %arg2[%c38_41] : memref<63xf32, #tpu.memory_space<smem>>
    %237 = vector.broadcast %236 : f32 to vector<2x1024xf32>
    %238 = arith.cmpf ogt, %5, %237 : vector<2x1024xf32>
    %c39 = arith.constant 39 : index
    %239 = memref.load %arg1[%c39] : memref<64xf32, #tpu.memory_space<smem>>
    %240 = vector.broadcast %239 : f32 to vector<2x1024xf32>
    %241 = arith.select %238, %240, %235 : vector<2x1024xi1>, vector<2x1024xf32>
    %c39_42 = arith.constant 39 : index
    %242 = memref.load %arg2[%c39_42] : memref<63xf32, #tpu.memory_space<smem>>
    %243 = vector.broadcast %242 : f32 to vector<2x1024xf32>
    %244 = arith.cmpf ogt, %5, %243 : vector<2x1024xf32>
    %c40 = arith.constant 40 : index
    %245 = memref.load %arg1[%c40] : memref<64xf32, #tpu.memory_space<smem>>
    %246 = vector.broadcast %245 : f32 to vector<2x1024xf32>
    %247 = arith.select %244, %246, %241 : vector<2x1024xi1>, vector<2x1024xf32>
    %c40_43 = arith.constant 40 : index
    %248 = memref.load %arg2[%c40_43] : memref<63xf32, #tpu.memory_space<smem>>
    %249 = vector.broadcast %248 : f32 to vector<2x1024xf32>
    %250 = arith.cmpf ogt, %5, %249 : vector<2x1024xf32>
    %c41 = arith.constant 41 : index
    %251 = memref.load %arg1[%c41] : memref<64xf32, #tpu.memory_space<smem>>
    %252 = vector.broadcast %251 : f32 to vector<2x1024xf32>
    %253 = arith.select %250, %252, %247 : vector<2x1024xi1>, vector<2x1024xf32>
    %c41_44 = arith.constant 41 : index
    %254 = memref.load %arg2[%c41_44] : memref<63xf32, #tpu.memory_space<smem>>
    %255 = vector.broadcast %254 : f32 to vector<2x1024xf32>
    %256 = arith.cmpf ogt, %5, %255 : vector<2x1024xf32>
    %c42 = arith.constant 42 : index
    %257 = memref.load %arg1[%c42] : memref<64xf32, #tpu.memory_space<smem>>
    %258 = vector.broadcast %257 : f32 to vector<2x1024xf32>
    %259 = arith.select %256, %258, %253 : vector<2x1024xi1>, vector<2x1024xf32>
    %c42_45 = arith.constant 42 : index
    %260 = memref.load %arg2[%c42_45] : memref<63xf32, #tpu.memory_space<smem>>
    %261 = vector.broadcast %260 : f32 to vector<2x1024xf32>
    %262 = arith.cmpf ogt, %5, %261 : vector<2x1024xf32>
    %c43 = arith.constant 43 : index
    %263 = memref.load %arg1[%c43] : memref<64xf32, #tpu.memory_space<smem>>
    %264 = vector.broadcast %263 : f32 to vector<2x1024xf32>
    %265 = arith.select %262, %264, %259 : vector<2x1024xi1>, vector<2x1024xf32>
    %c43_46 = arith.constant 43 : index
    %266 = memref.load %arg2[%c43_46] : memref<63xf32, #tpu.memory_space<smem>>
    %267 = vector.broadcast %266 : f32 to vector<2x1024xf32>
    %268 = arith.cmpf ogt, %5, %267 : vector<2x1024xf32>
    %c44 = arith.constant 44 : index
    %269 = memref.load %arg1[%c44] : memref<64xf32, #tpu.memory_space<smem>>
    %270 = vector.broadcast %269 : f32 to vector<2x1024xf32>
    %271 = arith.select %268, %270, %265 : vector<2x1024xi1>, vector<2x1024xf32>
    %c44_47 = arith.constant 44 : index
    %272 = memref.load %arg2[%c44_47] : memref<63xf32, #tpu.memory_space<smem>>
    %273 = vector.broadcast %272 : f32 to vector<2x1024xf32>
    %274 = arith.cmpf ogt, %5, %273 : vector<2x1024xf32>
    %c45 = arith.constant 45 : index
    %275 = memref.load %arg1[%c45] : memref<64xf32, #tpu.memory_space<smem>>
    %276 = vector.broadcast %275 : f32 to vector<2x1024xf32>
    %277 = arith.select %274, %276, %271 : vector<2x1024xi1>, vector<2x1024xf32>
    %c45_48 = arith.constant 45 : index
    %278 = memref.load %arg2[%c45_48] : memref<63xf32, #tpu.memory_space<smem>>
    %279 = vector.broadcast %278 : f32 to vector<2x1024xf32>
    %280 = arith.cmpf ogt, %5, %279 : vector<2x1024xf32>
    %c46 = arith.constant 46 : index
    %281 = memref.load %arg1[%c46] : memref<64xf32, #tpu.memory_space<smem>>
    %282 = vector.broadcast %281 : f32 to vector<2x1024xf32>
    %283 = arith.select %280, %282, %277 : vector<2x1024xi1>, vector<2x1024xf32>
    %c46_49 = arith.constant 46 : index
    %284 = memref.load %arg2[%c46_49] : memref<63xf32, #tpu.memory_space<smem>>
    %285 = vector.broadcast %284 : f32 to vector<2x1024xf32>
    %286 = arith.cmpf ogt, %5, %285 : vector<2x1024xf32>
    %c47 = arith.constant 47 : index
    %287 = memref.load %arg1[%c47] : memref<64xf32, #tpu.memory_space<smem>>
    %288 = vector.broadcast %287 : f32 to vector<2x1024xf32>
    %289 = arith.select %286, %288, %283 : vector<2x1024xi1>, vector<2x1024xf32>
    %c47_50 = arith.constant 47 : index
    %290 = memref.load %arg2[%c47_50] : memref<63xf32, #tpu.memory_space<smem>>
    %291 = vector.broadcast %290 : f32 to vector<2x1024xf32>
    %292 = arith.cmpf ogt, %5, %291 : vector<2x1024xf32>
    %c48 = arith.constant 48 : index
    %293 = memref.load %arg1[%c48] : memref<64xf32, #tpu.memory_space<smem>>
    %294 = vector.broadcast %293 : f32 to vector<2x1024xf32>
    %295 = arith.select %292, %294, %289 : vector<2x1024xi1>, vector<2x1024xf32>
    %c48_51 = arith.constant 48 : index
    %296 = memref.load %arg2[%c48_51] : memref<63xf32, #tpu.memory_space<smem>>
    %297 = vector.broadcast %296 : f32 to vector<2x1024xf32>
    %298 = arith.cmpf ogt, %5, %297 : vector<2x1024xf32>
    %c49 = arith.constant 49 : index
    %299 = memref.load %arg1[%c49] : memref<64xf32, #tpu.memory_space<smem>>
    %300 = vector.broadcast %299 : f32 to vector<2x1024xf32>
    %301 = arith.select %298, %300, %295 : vector<2x1024xi1>, vector<2x1024xf32>
    %c49_52 = arith.constant 49 : index
    %302 = memref.load %arg2[%c49_52] : memref<63xf32, #tpu.memory_space<smem>>
    %303 = vector.broadcast %302 : f32 to vector<2x1024xf32>
    %304 = arith.cmpf ogt, %5, %303 : vector<2x1024xf32>
    %c50 = arith.constant 50 : index
    %305 = memref.load %arg1[%c50] : memref<64xf32, #tpu.memory_space<smem>>
    %306 = vector.broadcast %305 : f32 to vector<2x1024xf32>
    %307 = arith.select %304, %306, %301 : vector<2x1024xi1>, vector<2x1024xf32>
    %c50_53 = arith.constant 50 : index
    %308 = memref.load %arg2[%c50_53] : memref<63xf32, #tpu.memory_space<smem>>
    %309 = vector.broadcast %308 : f32 to vector<2x1024xf32>
    %310 = arith.cmpf ogt, %5, %309 : vector<2x1024xf32>
    %c51 = arith.constant 51 : index
    %311 = memref.load %arg1[%c51] : memref<64xf32, #tpu.memory_space<smem>>
    %312 = vector.broadcast %311 : f32 to vector<2x1024xf32>
    %313 = arith.select %310, %312, %307 : vector<2x1024xi1>, vector<2x1024xf32>
    %c51_54 = arith.constant 51 : index
    %314 = memref.load %arg2[%c51_54] : memref<63xf32, #tpu.memory_space<smem>>
    %315 = vector.broadcast %314 : f32 to vector<2x1024xf32>
    %316 = arith.cmpf ogt, %5, %315 : vector<2x1024xf32>
    %c52 = arith.constant 52 : index
    %317 = memref.load %arg1[%c52] : memref<64xf32, #tpu.memory_space<smem>>
    %318 = vector.broadcast %317 : f32 to vector<2x1024xf32>
    %319 = arith.select %316, %318, %313 : vector<2x1024xi1>, vector<2x1024xf32>
    %c52_55 = arith.constant 52 : index
    %320 = memref.load %arg2[%c52_55] : memref<63xf32, #tpu.memory_space<smem>>
    %321 = vector.broadcast %320 : f32 to vector<2x1024xf32>
    %322 = arith.cmpf ogt, %5, %321 : vector<2x1024xf32>
    %c53 = arith.constant 53 : index
    %323 = memref.load %arg1[%c53] : memref<64xf32, #tpu.memory_space<smem>>
    %324 = vector.broadcast %323 : f32 to vector<2x1024xf32>
    %325 = arith.select %322, %324, %319 : vector<2x1024xi1>, vector<2x1024xf32>
    %c53_56 = arith.constant 53 : index
    %326 = memref.load %arg2[%c53_56] : memref<63xf32, #tpu.memory_space<smem>>
    %327 = vector.broadcast %326 : f32 to vector<2x1024xf32>
    %328 = arith.cmpf ogt, %5, %327 : vector<2x1024xf32>
    %c54 = arith.constant 54 : index
    %329 = memref.load %arg1[%c54] : memref<64xf32, #tpu.memory_space<smem>>
    %330 = vector.broadcast %329 : f32 to vector<2x1024xf32>
    %331 = arith.select %328, %330, %325 : vector<2x1024xi1>, vector<2x1024xf32>
    %c54_57 = arith.constant 54 : index
    %332 = memref.load %arg2[%c54_57] : memref<63xf32, #tpu.memory_space<smem>>
    %333 = vector.broadcast %332 : f32 to vector<2x1024xf32>
    %334 = arith.cmpf ogt, %5, %333 : vector<2x1024xf32>
    %c55 = arith.constant 55 : index
    %335 = memref.load %arg1[%c55] : memref<64xf32, #tpu.memory_space<smem>>
    %336 = vector.broadcast %335 : f32 to vector<2x1024xf32>
    %337 = arith.select %334, %336, %331 : vector<2x1024xi1>, vector<2x1024xf32>
    %c55_58 = arith.constant 55 : index
    %338 = memref.load %arg2[%c55_58] : memref<63xf32, #tpu.memory_space<smem>>
    %339 = vector.broadcast %338 : f32 to vector<2x1024xf32>
    %340 = arith.cmpf ogt, %5, %339 : vector<2x1024xf32>
    %c56 = arith.constant 56 : index
    %341 = memref.load %arg1[%c56] : memref<64xf32, #tpu.memory_space<smem>>
    %342 = vector.broadcast %341 : f32 to vector<2x1024xf32>
    %343 = arith.select %340, %342, %337 : vector<2x1024xi1>, vector<2x1024xf32>
    %c56_59 = arith.constant 56 : index
    %344 = memref.load %arg2[%c56_59] : memref<63xf32, #tpu.memory_space<smem>>
    %345 = vector.broadcast %344 : f32 to vector<2x1024xf32>
    %346 = arith.cmpf ogt, %5, %345 : vector<2x1024xf32>
    %c57 = arith.constant 57 : index
    %347 = memref.load %arg1[%c57] : memref<64xf32, #tpu.memory_space<smem>>
    %348 = vector.broadcast %347 : f32 to vector<2x1024xf32>
    %349 = arith.select %346, %348, %343 : vector<2x1024xi1>, vector<2x1024xf32>
    %c57_60 = arith.constant 57 : index
    %350 = memref.load %arg2[%c57_60] : memref<63xf32, #tpu.memory_space<smem>>
    %351 = vector.broadcast %350 : f32 to vector<2x1024xf32>
    %352 = arith.cmpf ogt, %5, %351 : vector<2x1024xf32>
    %c58 = arith.constant 58 : index
    %353 = memref.load %arg1[%c58] : memref<64xf32, #tpu.memory_space<smem>>
    %354 = vector.broadcast %353 : f32 to vector<2x1024xf32>
    %355 = arith.select %352, %354, %349 : vector<2x1024xi1>, vector<2x1024xf32>
    %c58_61 = arith.constant 58 : index
    %356 = memref.load %arg2[%c58_61] : memref<63xf32, #tpu.memory_space<smem>>
    %357 = vector.broadcast %356 : f32 to vector<2x1024xf32>
    %358 = arith.cmpf ogt, %5, %357 : vector<2x1024xf32>
    %c59 = arith.constant 59 : index
    %359 = memref.load %arg1[%c59] : memref<64xf32, #tpu.memory_space<smem>>
    %360 = vector.broadcast %359 : f32 to vector<2x1024xf32>
    %361 = arith.select %358, %360, %355 : vector<2x1024xi1>, vector<2x1024xf32>
    %c59_62 = arith.constant 59 : index
    %362 = memref.load %arg2[%c59_62] : memref<63xf32, #tpu.memory_space<smem>>
    %363 = vector.broadcast %362 : f32 to vector<2x1024xf32>
    %364 = arith.cmpf ogt, %5, %363 : vector<2x1024xf32>
    %c60 = arith.constant 60 : index
    %365 = memref.load %arg1[%c60] : memref<64xf32, #tpu.memory_space<smem>>
    %366 = vector.broadcast %365 : f32 to vector<2x1024xf32>
    %367 = arith.select %364, %366, %361 : vector<2x1024xi1>, vector<2x1024xf32>
    %c60_63 = arith.constant 60 : index
    %368 = memref.load %arg2[%c60_63] : memref<63xf32, #tpu.memory_space<smem>>
    %369 = vector.broadcast %368 : f32 to vector<2x1024xf32>
    %370 = arith.cmpf ogt, %5, %369 : vector<2x1024xf32>
    %c61 = arith.constant 61 : index
    %371 = memref.load %arg1[%c61] : memref<64xf32, #tpu.memory_space<smem>>
    %372 = vector.broadcast %371 : f32 to vector<2x1024xf32>
    %373 = arith.select %370, %372, %367 : vector<2x1024xi1>, vector<2x1024xf32>
    %c61_64 = arith.constant 61 : index
    %374 = memref.load %arg2[%c61_64] : memref<63xf32, #tpu.memory_space<smem>>
    %375 = vector.broadcast %374 : f32 to vector<2x1024xf32>
    %376 = arith.cmpf ogt, %5, %375 : vector<2x1024xf32>
    %c62 = arith.constant 62 : index
    %377 = memref.load %arg1[%c62] : memref<64xf32, #tpu.memory_space<smem>>
    %378 = vector.broadcast %377 : f32 to vector<2x1024xf32>
    %379 = arith.select %376, %378, %373 : vector<2x1024xi1>, vector<2x1024xf32>
    %c62_65 = arith.constant 62 : index
    %380 = memref.load %arg2[%c62_65] : memref<63xf32, #tpu.memory_space<smem>>
    %381 = vector.broadcast %380 : f32 to vector<2x1024xf32>
    %382 = arith.cmpf ogt, %5, %381 : vector<2x1024xf32>
    %c63 = arith.constant 63 : index
    %383 = memref.load %arg1[%c63] : memref<64xf32, #tpu.memory_space<smem>>
    %384 = vector.broadcast %383 : f32 to vector<2x1024xf32>
    %385 = arith.select %382, %384, %379 : vector<2x1024xi1>, vector<2x1024xf32>
    %c0_66 = arith.constant 0 : index
    %c0_67 = arith.constant 0 : index
    %386 = vector.load %arg4[%c0_66, %c0_67] : memref<2x1024xf32, #tpu.memory_space<vmem>>, vector<2x1024xf32>
    tpu.vector_store %arg4[%c0_66, %c0_67], %385 {strides = array<i32>} : memref<2x1024xf32, #tpu.memory_space<vmem>>, vector<2x1024xf32>,
    return
  }
  func.func @transform_0(%arg0: i32) -> i32 {
    %c0_i32 = arith.constant 0 : i32
    %c0_i32_0 = arith.constant 0 : i32
    return %c0_i32 : i32
  }
  func.func @transform_1(%arg0: i32) -> i32 {
    %c0_i32 = arith.constant 0 : i32
    %c0_i32_0 = arith.constant 0 : i32
    return %c0_i32 : i32
  }
  func.func @transform_2(%arg0: i32) -> (i32, i32) {
    %c0_i32 = arith.constant 0 : i32
    %c0_i32_0 = arith.constant 0 : i32
    return %arg0, %c0_i32 : i32, i32
  }
  func.func @transform_3(%arg0: i32) -> (i32, i32) {
    %c0_i32 = arith.constant 0 : i32
    %c0_i32_0 = arith.constant 0 : i32
    return %arg0, %c0_i32 : i32, i32
  }
}

</mosaic_0001>

<bundles_post_ra>
// kernel: tpu_custom_call.1
= control target key start
LH: loop header
LB: loop body
LE: loop exit
PB: predicated region body
PF: predicated region fallthrough
CT: control target
= control target key end

     0   :  { %8 = vsyncpa [#allocation5], 0  ;;  %s964_s0 = inlined_call_operand.hbm [shape: f32[64], index: 0, kind: input, shape index: {}]   ;;  %s965_s1 = inlined_call_operand.hbm [shape: f32[63], index: 1, kind: input, shape index: {}]   ;;  %s966_s2 = inlined_call_operand.hbm [shape: f32[2,1024], index: 2, kind: input, shape index: {}]   ;;  %s967_s3 = inlined_call_operand.hbm [shape: f32[2,1024], index: 3, kind: output, shape index: {}]  }
   0x1   :  { %9 = vsyncpa [#allocation7], 0 }
   0x2   :  { %10 = vsyncpa [#allocation3], 0 }
   0x3   :  { %11 = vsyncpa [#allocation4], 0  ;;  %s17_s14 = sshll.u32 %s964_s0, 4  ;;  %s26_s17 = sshll.u32 %s965_s1, 4  ;;  %s18_s14 = int_to_ptr.hbm [resolvable:$true] %s17_s14  ;;  %s27_s17 = int_to_ptr.hbm [resolvable:$true] %s26_s17 }
   0x4   :  { %s798_s18 = smov [#allocation2]   ;;  %s799_s19 = smov [#allocation6]  }
   0x5   :  { %20 = dma.hbm_to_smem %s18_s14, 16, %s798_s18, [#allocation5]  }
   0x6   :  { %29 = dma.hbm_to_smem %s27_s17, 16, %s799_s19, [#allocation7]  }
   0x7   :  { %s35_s22 = sshll.u32 %s966_s2, 4  ;;  %s800_s23 = smov [#allocation8]   ;;  %s36_s22 = int_to_ptr.hbm [resolvable:$true] %s35_s22 }
   0x8   :  { %s37_s24 = sshll.u32 %s800_s23, 4  ;;  %s38_s24 = int_to_ptr.vmem [resolvable:$true] %s37_s24 }
   0x9   :  { %40 = dma.hbm_to_vmem [thread:$0]  %s36_s22, 256, %s38_s24, [#allocation3]  }
   0xa   :  { %790 = dma.done.wait [#allocation5], 16  }
   0xb   :  { %791 = vsyncadd [#allocation5], 4294967280 }
   0xc   :  { %792 = dma.done.wait [#allocation7], 16  }
   0xd   :  { %793 = vsyncadd [#allocation7], 4294967280 }
   0xe   :  { %794 = dma.done.wait [#allocation3], 256  }
   0xf   :  { %795 = vsyncadd [#allocation3], 4294967040 }
  0x10   :  { %53 = sfence }
  0x11   :  { %v54_v0 = vld [vmem:[#allocation8] sm:$0xff]  ;;  %v55_v1 = vld [vmem:[#allocation8 + $0x8] sm:$0xff]  ;;  %s62_s0 = sld [smem:[#allocation2]] }
  0x12   :  { %v58_v2 = vmul.f32 0.01, %v54_v0  ;;  %v59_v3 = vmul.f32 0.01, %v55_v1  ;;  %s64_s1 = sld [smem:[#allocation6]]  ;;  %vm56_vm0 = vcmp.ge.f32.partialorder %v54_v0, 0.0 }
  0x13   :  { %vm57_vm1 = vcmp.ge.f32.partialorder %v55_v1, 0.0  ;;  %s589_s2 = sld [smem:[#allocation2 + $0x1]] }
  0x14   :  { %s590_s25 = sld [smem:[#allocation6 + $0x1]]  ;;  %v831_v4 = vsel %vm56_vm0, %v54_v0, %v58_v2  ;;  %v833_v5 = vsel %vm57_vm1, %v55_v1, %v59_v3 }
  0x15   :  { %s591_s26 = sld [smem:[#allocation2 + $0x2]] }
  0x16   :  { %s592_s27 = sld [smem:[#allocation6 + $0x2]] }
  0x17   :  { %v63_v6 = vstv %s62_s0  ;;  %s593_s28 = sld [smem:[#allocation2 + $0x3]] }
  0x18   :  { %v65_v7 = vstv %s64_s1  ;;  %s594_s29 = sld [smem:[#allocation6 + $0x3]] }
  0x19   :  { %vm66_vm2 = vcmp.gt.f32.partialorder %v831_v4, %v65_v7  ;;  %vm67_vm3 = vcmp.gt.f32.partialorder %v833_v5, %v65_v7  ;;  %v69_v8 = vstv %s589_s2  ;;  %s595_s30 = sld [smem:[#allocation2 + $0x4]] }
  0x1a   :  { %v70_v9 = vsel %vm66_vm2, %v69_v8, %v63_v6  ;;  %v71_v10 = vsel %vm67_vm3, %v69_v8, %v63_v6  ;;  %v73_v11 = vstv %s590_s25  ;;  %s596_s4 = sld [smem:[#allocation6 + $0x4]] }
  0x1b   :  { %vm74_vm4 = vcmp.gt.f32.partialorder %v831_v4, %v73_v11  ;;  %vm75_vm5 = vcmp.gt.f32.partialorder %v833_v5, %v73_v11  ;;  %v77_v12 = vstv %s591_s26  ;;  %s597_s5 = sld [smem:[#allocation2 + $0x5]] }
  0x1c   :  { %v78_v13 = vsel %vm74_vm4, %v77_v12, %v70_v9  ;;  %v79_v14 = vsel %vm75_vm5, %v77_v12, %v71_v10  ;;  %v81_v15 = vstv %s592_s27  ;;  %s598_s6 = sld [smem:[#allocation6 + $0x5]] }
  0x1d   :  { %vm82_vm6 = vcmp.gt.f32.partialorder %v831_v4, %v81_v15  ;;  %vm83_vm7 = vcmp.gt.f32.partialorder %v833_v5, %v81_v15  ;;  %v85_v16 = vstv %s593_s28  ;;  %s599_s7 = sld [smem:[#allocation2 + $0x6]] }
  0x1e   :  { %v86_v17 = vsel %vm82_vm6, %v85_v16, %v78_v13  ;;  %v87_v18 = vsel %vm83_vm7, %v85_v16, %v79_v14  ;;  %v89_v19 = vstv %s594_s29  ;;  %s600_s8 = sld [smem:[#allocation6 + $0x6]] }
  0x1f   :  { %vm90_vm8 = vcmp.gt.f32.partialorder %v831_v4, %v89_v19  ;;  %vm91_vm9 = vcmp.gt.f32.partialorder %v833_v5, %v89_v19  ;;  %v93_v20 = vstv %s595_s30  ;;  %s601_s9 = sld [smem:[#allocation2 + $0x7]] }
  0x20   :  { %v94_v21 = vsel %vm90_vm8, %v93_v20, %v86_v17  ;;  %v95_v22 = vsel %vm91_vm9, %v93_v20, %v87_v18  ;;  %v97_v23 = vstv %s596_s4  ;;  %s602_s10 = sld [smem:[#allocation6 + $0x7]] }
  0x21   :  { %vm98_vm10 = vcmp.gt.f32.partialorder %v831_v4, %v97_v23  ;;  %vm99_vm11 = vcmp.gt.f32.partialorder %v833_v5, %v97_v23  ;;  %v101_v24 = vstv %s597_s5  ;;  %s603_s11 = sld [smem:[#allocation2 + $0x8]] }
  0x22   :  { %v102_v25 = vsel %vm98_vm10, %v101_v24, %v94_v21  ;;  %v103_v26 = vsel %vm99_vm11, %v101_v24, %v95_v22  ;;  %v105_v27 = vstv %s598_s6  ;;  %s604_s12 = sld [smem:[#allocation6 + $0x8]] }
  0x23   :  { %vm106_vm12 = vcmp.gt.f32.partialorder %v831_v4, %v105_v27  ;;  %vm107_vm13 = vcmp.gt.f32.partialorder %v833_v5, %v105_v27  ;;  %v109_v28 = vstv %s599_s7  ;;  %s605_s13 = sld [smem:[#allocation2 + $0x9]] }
  0x24   :  { %v110_v29 = vsel %vm106_vm12, %v109_v28, %v102_v25  ;;  %v111_v30 = vsel %vm107_vm13, %v109_v28, %v103_v26  ;;  %v113_v31 = vstv %s600_s8  ;;  %s606_s14 = sld [smem:[#allocation6 + $0x9]] }
  0x25   :  { %vm114_vm14 = vcmp.gt.f32.partialorder %v831_v4, %v113_v31  ;;  %vm115_vm15 = vcmp.gt.f32.partialorder %v833_v5, %v113_v31  ;;  %v117_v32 = vstv %s601_s9  ;;  %s607_s15 = sld [smem:[#allocation2 + $0xa]] }
  0x26   :  { %v118_v33 = vsel %vm114_vm14, %v117_v32, %v110_v29  ;;  %v119_v34 = vsel %vm115_vm15, %v117_v32, %v111_v30  ;;  %v121_v35 = vstv %s602_s10  ;;  %s608_s16 = sld [smem:[#allocation6 + $0xa]] }
  0x27   :  { %vm122_vm0 = vcmp.gt.f32.partialorder %v831_v4, %v121_v35  ;;  %vm123_vm1 = vcmp.gt.f32.partialorder %v833_v5, %v121_v35  ;;  %v125_v36 = vstv %s603_s11  ;;  %s609_s17 = sld [smem:[#allocation2 + $0xb]] }
  0x28   :  { %v126_v37 = vsel %vm122_vm0, %v125_v36, %v118_v33  ;;  %v127_v38 = vsel %vm123_vm1, %v125_v36, %v119_v34  ;;  %v129_v39 = vstv %s604_s12  ;;  %s610_s18 = sld [smem:[#allocation6 + $0xb]] }
  0x29   :  { %vm130_vm2 = vcmp.gt.f32.partialorder %v831_v4, %v129_v39  ;;  %vm131_vm3 = vcmp.gt.f32.partialorder %v833_v5, %v129_v39  ;;  %v133_v40 = vstv %s605_s13  ;;  %s611_s19 = sld [smem:[#allocation2 + $0xc]] }
  0x2a   :  { %v134_v41 = vsel %vm130_vm2, %v133_v40, %v126_v37  ;;  %v135_v42 = vsel %vm131_vm3, %v133_v40, %v127_v38  ;;  %v137_v43 = vstv %s606_s14  ;;  %s612_s20 = sld [smem:[#allocation6 + $0xc]] }
  0x2b   :  { %vm138_vm4 = vcmp.gt.f32.partialorder %v831_v4, %v137_v43  ;;  %vm139_vm5 = vcmp.gt.f32.partialorder %v833_v5, %v137_v43  ;;  %v141_v44 = vstv %s607_s15  ;;  %s613_s21 = sld [smem:[#allocation2 + $0xd]] }
  0x2c   :  { %v142_v45 = vsel %vm138_vm4, %v141_v44, %v134_v41  ;;  %v143_v46 = vsel %vm139_vm5, %v141_v44, %v135_v42  ;;  %v145_v47 = vstv %s608_s16  ;;  %s614_s22 = sld [smem:[#allocation6 + $0xd]] }
  0x2d   :  { %vm146_vm6 = vcmp.gt.f32.partialorder %v831_v4, %v145_v47  ;;  %vm147_vm7 = vcmp.gt.f32.partialorder %v833_v5, %v145_v47  ;;  %v149_v48 = vstv %s609_s17  ;;  %s615_s23 = sld [smem:[#allocation2 + $0xe]] }
  0x2e   :  { %v150_v49 = vsel %vm146_vm6, %v149_v48, %v142_v45  ;;  %v151_v50 = vsel %vm147_vm7, %v149_v48, %v143_v46  ;;  %v153_v51 = vstv %s610_s18  ;;  %s616_s24 = sld [smem:[#allocation6 + $0xe]] }
  0x2f   :  { %vm154_vm8 = vcmp.gt.f32.partialorder %v831_v4, %v153_v51  ;;  %vm155_vm9 = vcmp.gt.f32.partialorder %v833_v5, %v153_v51  ;;  %v157_v52 = vstv %s611_s19  ;;  %s617_s0 = sld [smem:[#allocation2 + $0xf]] }
  0x30   :  { %v158_v53 = vsel %vm154_vm8, %v157_v52, %v150_v49  ;;  %v159_v54 = vsel %vm155_vm9, %v157_v52, %v151_v50  ;;  %v161_v55 = vstv %s612_s20  ;;  %s618_s1 = sld [smem:[#allocation6 + $0xf]] }
  0x31   :  { %vm162_vm10 = vcmp.gt.f32.partialorder %v831_v4, %v161_v55  ;;  %vm163_vm11 = vcmp.gt.f32.partialorder %v833_v5, %v161_v55  ;;  %v165_v56 = vstv %s613_s21  ;;  %s619_s2 = sld [smem:[#allocation2 + $0x10]] }
  0x32   :  { %v166_v57 = vsel %vm162_vm10, %v165_v56, %v158_v53  ;;  %v167_v58 = vsel %vm163_vm11, %v165_v56, %v159_v54  ;;  %v169_v59 = vstv %s614_s22  ;;  %s620_s25 = sld [smem:[#allocation6 + $0x10]] }
  0x33   :  { %vm170_vm12 = vcmp.gt.f32.partialorder %v831_v4, %v169_v59  ;;  %vm171_vm13 = vcmp.gt.f32.partialorder %v833_v5, %v169_v59  ;;  %v173_v60 = vstv %s615_s23  ;;  %s621_s26 = sld [smem:[#allocation2 + $0x11]] }
  0x34   :  { %v174_v61 = vsel %vm170_vm12, %v173_v60, %v166_v57  ;;  %v175_v62 = vsel %vm171_vm13, %v173_v60, %v167_v58  ;;  %v177_v63 = vstv %s616_s24  ;;  %s622_s27 = sld [smem:[#allocation6 + $0x11]] }
  0x35   :  { %vm178_vm14 = vcmp.gt.f32.partialorder %v831_v4, %v177_v63  ;;  %vm179_vm15 = vcmp.gt.f32.partialorder %v833_v5, %v177_v63  ;;  %v181_v0 = vstv %s617_s0  ;;  %s623_s28 = sld [smem:[#allocation2 + $0x12]] }
  0x36   :  { %v182_v1 = vsel %vm178_vm14, %v181_v0, %v174_v61  ;;  %v183_v2 = vsel %vm179_vm15, %v181_v0, %v175_v62  ;;  %v185_v3 = vstv %s618_s1  ;;  %s624_s29 = sld [smem:[#allocation6 + $0x12]] }
  0x37   :  { %vm186_vm0 = vcmp.gt.f32.partialorder %v831_v4, %v185_v3  ;;  %vm187_vm1 = vcmp.gt.f32.partialorder %v833_v5, %v185_v3  ;;  %v189_v6 = vstv %s619_s2  ;;  %s625_s30 = sld [smem:[#allocation2 + $0x13]] }
  0x38   :  { %v190_v7 = vsel %vm186_vm0, %v189_v6, %v182_v1  ;;  %v191_v8 = vsel %vm187_vm1, %v189_v6, %v183_v2  ;;  %v193_v9 = vstv %s620_s25  ;;  %s626_s4 = sld [smem:[#allocation6 + $0x13]] }
  0x39   :  { %vm194_vm2 = vcmp.gt.f32.partialorder %v831_v4, %v193_v9  ;;  %vm195_vm3 = vcmp.gt.f32.partialorder %v833_v5, %v193_v9  ;;  %v197_v10 = vstv %s621_s26  ;;  %s627_s5 = sld [smem:[#allocation2 + $0x14]] }
  0x3a   :  { %v198_v11 = vsel %vm194_vm2, %v197_v10, %v190_v7  ;;  %v199_v12 = vsel %vm195_vm3, %v197_v10, %v191_v8  ;;  %v201_v13 = vstv %s622_s27  ;;  %s628_s6 = sld [smem:[#allocation6 + $0x14]] }
  0x3b   :  { %vm202_vm4 = vcmp.gt.f32.partialorder %v831_v4, %v201_v13  ;;  %vm203_vm5 = vcmp.gt.f32.partialorder %v833_v5, %v201_v13  ;;  %v205_v14 = vstv %s623_s28  ;;  %s629_s7 = sld [smem:[#allocation2 + $0x15]] }
  0x3c   :  { %v206_v15 = vsel %vm202_vm4, %v205_v14, %v198_v11  ;;  %v207_v16 = vsel %vm203_vm5, %v205_v14, %v199_v12  ;;  %v209_v17 = vstv %s624_s29  ;;  %s630_s8 = sld [smem:[#allocation6 + $0x15]] }
  0x3d   :  { %vm210_vm6 = vcmp.gt.f32.partialorder %v831_v4, %v209_v17  ;;  %vm211_vm7 = vcmp.gt.f32.partialorder %v833_v5, %v209_v17  ;;  %v213_v18 = vstv %s625_s30  ;;  %s631_s9 = sld [smem:[#allocation2 + $0x16]] }
  0x3e   :  { %v214_v19 = vsel %vm210_vm6, %v213_v18, %v206_v15  ;;  %v215_v20 = vsel %vm211_vm7, %v213_v18, %v207_v16  ;;  %v217_v21 = vstv %s626_s4  ;;  %s632_s10 = sld [smem:[#allocation6 + $0x16]] }
  0x3f   :  { %vm218_vm8 = vcmp.gt.f32.partialorder %v831_v4, %v217_v21  ;;  %vm219_vm9 = vcmp.gt.f32.partialorder %v833_v5, %v217_v21  ;;  %v221_v22 = vstv %s627_s5  ;;  %s633_s11 = sld [smem:[#allocation2 + $0x17]] }
  0x40   :  { %v222_v23 = vsel %vm218_vm8, %v221_v22, %v214_v19  ;;  %v223_v24 = vsel %vm219_vm9, %v221_v22, %v215_v20  ;;  %v225_v25 = vstv %s628_s6  ;;  %s634_s12 = sld [smem:[#allocation6 + $0x17]] }
  0x41   :  { %vm226_vm10 = vcmp.gt.f32.partialorder %v831_v4, %v225_v25  ;;  %vm227_vm11 = vcmp.gt.f32.partialorder %v833_v5, %v225_v25  ;;  %v229_v26 = vstv %s629_s7  ;;  %s635_s13 = sld [smem:[#allocation2 + $0x18]] }
  0x42   :  { %v230_v27 = vsel %vm226_vm10, %v229_v26, %v222_v23  ;;  %v231_v28 = vsel %vm227_vm11, %v229_v26, %v223_v24  ;;  %v233_v29 = vstv %s630_s8  ;;  %s636_s14 = sld [smem:[#allocation6 + $0x18]] }
  0x43   :  { %vm234_vm12 = vcmp.gt.f32.partialorder %v831_v4, %v233_v29  ;;  %vm235_vm13 = vcmp.gt.f32.partialorder %v833_v5, %v233_v29  ;;  %v237_v30 = vstv %s631_s9  ;;  %s637_s15 = sld [smem:[#allocation2 + $0x19]] }
  0x44   :  { %v238_v31 = vsel %vm234_vm12, %v237_v30, %v230_v27  ;;  %v239_v32 = vsel %vm235_vm13, %v237_v30, %v231_v28  ;;  %v241_v33 = vstv %s632_s10  ;;  %s638_s16 = sld [smem:[#allocation6 + $0x19]] }
  0x45   :  { %vm242_vm14 = vcmp.gt.f32.partialorder %v831_v4, %v241_v33  ;;  %vm243_vm15 = vcmp.gt.f32.partialorder %v833_v5, %v241_v33  ;;  %v245_v34 = vstv %s633_s11  ;;  %s639_s17 = sld [smem:[#allocation2 + $0x1a]] }
  0x46   :  { %v246_v35 = vsel %vm242_vm14, %v245_v34, %v238_v31  ;;  %v247_v36 = vsel %vm243_vm15, %v245_v34, %v239_v32  ;;  %v249_v37 = vstv %s634_s12  ;;  %s640_s18 = sld [smem:[#allocation6 + $0x1a]] }
  0x47   :  { %vm250_vm0 = vcmp.gt.f32.partialorder %v831_v4, %v249_v37  ;;  %vm251_vm1 = vcmp.gt.f32.partialorder %v833_v5, %v249_v37  ;;  %v253_v38 = vstv %s635_s13  ;;  %s641_s19 = sld [smem:[#allocation2 + $0x1b]] }
  0x48   :  { %v254_v39 = vsel %vm250_vm0, %v253_v38, %v246_v35  ;;  %v255_v40 = vsel %vm251_vm1, %v253_v38, %v247_v36  ;;  %v257_v41 = vstv %s636_s14  ;;  %s642_s20 = sld [smem:[#allocation6 + $0x1b]] }
  0x49   :  { %vm258_vm2 = vcmp.gt.f32.partialorder %v831_v4, %v257_v41  ;;  %vm259_vm3 = vcmp.gt.f32.partialorder %v833_v5, %v257_v41  ;;  %v261_v42 = vstv %s637_s15  ;;  %s643_s21 = sld [smem:[#allocation2 + $0x1c]] }
  0x4a   :  { %v262_v43 = vsel %vm258_vm2, %v261_v42, %v254_v39  ;;  %v263_v44 = vsel %vm259_vm3, %v261_v42, %v255_v40  ;;  %v265_v45 = vstv %s638_s16  ;;  %s644_s22 = sld [smem:[#allocation6 + $0x1c]] }
  0x4b   :  { %vm266_vm4 = vcmp.gt.f32.partialorder %v831_v4, %v265_v45  ;;  %vm267_vm5 = vcmp.gt.f32.partialorder %v833_v5, %v265_v45  ;;  %v269_v46 = vstv %s639_s17  ;;  %s645_s23 = sld [smem:[#allocation2 + $0x1d]] }
  0x4c   :  { %v270_v47 = vsel %vm266_vm4, %v269_v46, %v262_v43  ;;  %v271_v48 = vsel %vm267_vm5, %v269_v46, %v263_v44  ;;  %v273_v49 = vstv %s640_s18  ;;  %s646_s24 = sld [smem:[#allocation6 + $0x1d]] }
  0x4d   :  { %vm274_vm6 = vcmp.gt.f32.partialorder %v831_v4, %v273_v49  ;;  %vm275_vm7 = vcmp.gt.f32.partialorder %v833_v5, %v273_v49  ;;  %v277_v50 = vstv %s641_s19  ;;  %s647_s0 = sld [smem:[#allocation2 + $0x1e]] }
  0x4e   :  { %v278_v51 = vsel %vm274_vm6, %v277_v50, %v270_v47  ;;  %v279_v52 = vsel %vm275_vm7, %v277_v50, %v271_v48  ;;  %v281_v53 = vstv %s642_s20  ;;  %s648_s1 = sld [smem:[#allocation6 + $0x1e]] }
  0x4f   :  { %vm282_vm8 = vcmp.gt.f32.partialorder %v831_v4, %v281_v53  ;;  %vm283_vm9 = vcmp.gt.f32.partialorder %v833_v5, %v281_v53  ;;  %v285_v54 = vstv %s643_s21  ;;  %s649_s2 = sld [smem:[#allocation2 + $0x1f]] }
  0x50   :  { %v286_v55 = vsel %vm282_vm8, %v285_v54, %v278_v51  ;;  %v287_v56 = vsel %vm283_vm9, %v285_v54, %v279_v52  ;;  %v289_v57 = vstv %s644_s22  ;;  %s650_s25 = sld [smem:[#allocation6 + $0x1f]] }
  0x51   :  { %vm290_vm10 = vcmp.gt.f32.partialorder %v831_v4, %v289_v57  ;;  %vm291_vm11 = vcmp.gt.f32.partialorder %v833_v5, %v289_v57  ;;  %v293_v58 = vstv %s645_s23  ;;  %s651_s26 = sld [smem:[#allocation2 + $0x20]] }
  0x52   :  { %v294_v59 = vsel %vm290_vm10, %v293_v58, %v286_v55  ;;  %v295_v60 = vsel %vm291_vm11, %v293_v58, %v287_v56  ;;  %v297_v61 = vstv %s646_s24  ;;  %s652_s27 = sld [smem:[#allocation6 + $0x20]] }
  0x53   :  { %vm298_vm12 = vcmp.gt.f32.partialorder %v831_v4, %v297_v61  ;;  %vm299_vm13 = vcmp.gt.f32.partialorder %v833_v5, %v297_v61  ;;  %v301_v62 = vstv %s647_s0  ;;  %s653_s28 = sld [smem:[#allocation2 + $0x21]] }
  0x54   :  { %v302_v63 = vsel %vm298_vm12, %v301_v62, %v294_v59  ;;  %v303_v0 = vsel %vm299_vm13, %v301_v62, %v295_v60  ;;  %v305_v1 = vstv %s648_s1  ;;  %s654_s29 = sld [smem:[#allocation6 + $0x21]] }
  0x55   :  { %vm306_vm14 = vcmp.gt.f32.partialorder %v831_v4, %v305_v1  ;;  %vm307_vm15 = vcmp.gt.f32.partialorder %v833_v5, %v305_v1  ;;  %v309_v2 = vstv %s649_s2  ;;  %s655_s30 = sld [smem:[#allocation2 + $0x22]] }
  0x56   :  { %v310_v3 = vsel %vm306_vm14, %v309_v2, %v302_v63  ;;  %v311_v6 = vsel %vm307_vm15, %v309_v2, %v303_v0  ;;  %v313_v7 = vstv %s650_s25  ;;  %s656_s4 = sld [smem:[#allocation6 + $0x22]] }
  0x57   :  { %vm314_vm0 = vcmp.gt.f32.partialorder %v831_v4, %v313_v7  ;;  %vm315_vm1 = vcmp.gt.f32.partialorder %v833_v5, %v313_v7  ;;  %v317_v8 = vstv %s651_s26  ;;  %s657_s5 = sld [smem:[#allocation2 + $0x23]] }
  0x58   :  { %v318_v9 = vsel %vm314_vm0, %v317_v8, %v310_v3  ;;  %v319_v10 = vsel %vm315_vm1, %v317_v8, %v311_v6  ;;  %v321_v11 = vstv %s652_s27  ;;  %s658_s6 = sld [smem:[#allocation6 + $0x23]] }
  0x59   :  { %vm322_vm2 = vcmp.gt.f32.partialorder %v831_v4, %v321_v11  ;;  %vm323_vm3 = vcmp.gt.f32.partialorder %v833_v5, %v321_v11  ;;  %v325_v12 = vstv %s653_s28  ;;  %s659_s7 = sld [smem:[#allocation2 + $0x24]] }
  0x5a   :  { %v326_v13 = vsel %vm322_vm2, %v325_v12, %v318_v9  ;;  %v327_v14 = vsel %vm323_vm3, %v325_v12, %v319_v10  ;;  %v329_v15 = vstv %s654_s29  ;;  %s660_s8 = sld [smem:[#allocation6 + $0x24]] }
  0x5b   :  { %vm330_vm4 = vcmp.gt.f32.partialorder %v831_v4, %v329_v15  ;;  %vm331_vm5 = vcmp.gt.f32.partialorder %v833_v5, %v329_v15  ;;  %v333_v16 = vstv %s655_s30  ;;  %s661_s9 = sld [smem:[#allocation2 + $0x25]] }
  0x5c   :  { %v334_v17 = vsel %vm330_vm4, %v333_v16, %v326_v13  ;;  %v335_v18 = vsel %vm331_vm5, %v333_v16, %v327_v14  ;;  %v337_v19 = vstv %s656_s4  ;;  %s662_s10 = sld [smem:[#allocation6 + $0x25]] }
  0x5d   :  { %vm338_vm6 = vcmp.gt.f32.partialorder %v831_v4, %v337_v19  ;;  %vm339_vm7 = vcmp.gt.f32.partialorder %v833_v5, %v337_v19  ;;  %v341_v20 = vstv %s657_s5  ;;  %s663_s11 = sld [smem:[#allocation2 + $0x26]] }
  0x5e   :  { %v342_v21 = vsel %vm338_vm6, %v341_v20, %v334_v17  ;;  %v343_v22 = vsel %vm339_vm7, %v341_v20, %v335_v18  ;;  %v345_v23 = vstv %s658_s6  ;;  %s664_s12 = sld [smem:[#allocation6 + $0x26]] }
  0x5f   :  { %vm346_vm8 = vcmp.gt.f32.partialorder %v831_v4, %v345_v23  ;;  %vm347_vm9 = vcmp.gt.f32.partialorder %v833_v5, %v345_v23  ;;  %v349_v24 = vstv %s659_s7  ;;  %s665_s13 = sld [smem:[#allocation2 + $0x27]] }
  0x60   :  { %v350_v25 = vsel %vm346_vm8, %v349_v24, %v342_v21  ;;  %v351_v26 = vsel %vm347_vm9, %v349_v24, %v343_v22  ;;  %v353_v27 = vstv %s660_s8  ;;  %s666_s14 = sld [smem:[#allocation6 + $0x27]] }
  0x61   :  { %vm354_vm10 = vcmp.gt.f32.partialorder %v831_v4, %v353_v27  ;;  %vm355_vm11 = vcmp.gt.f32.partialorder %v833_v5, %v353_v27  ;;  %v357_v28 = vstv %s661_s9  ;;  %s667_s15 = sld [smem:[#allocation2 + $0x28]] }
  0x62   :  { %v358_v29 = vsel %vm354_vm10, %v357_v28, %v350_v25  ;;  %v359_v30 = vsel %vm355_vm11, %v357_v28, %v351_v26  ;;  %v361_v31 = vstv %s662_s10  ;;  %s668_s16 = sld [smem:[#allocation6 + $0x28]] }
  0x63   :  { %vm362_vm12 = vcmp.gt.f32.partialorder %v831_v4, %v361_v31  ;;  %vm363_vm13 = vcmp.gt.f32.partialorder %v833_v5, %v361_v31  ;;  %v365_v32 = vstv %s663_s11  ;;  %s669_s17 = sld [smem:[#allocation2 + $0x29]] }
  0x64   :  { %v366_v33 = vsel %vm362_vm12, %v365_v32, %v358_v29  ;;  %v367_v34 = vsel %vm363_vm13, %v365_v32, %v359_v30  ;;  %v369_v35 = vstv %s664_s12  ;;  %s670_s18 = sld [smem:[#allocation6 + $0x29]] }
  0x65   :  { %vm370_vm14 = vcmp.gt.f32.partialorder %v831_v4, %v369_v35  ;;  %vm371_vm15 = vcmp.gt.f32.partialorder %v833_v5, %v369_v35  ;;  %v373_v36 = vstv %s665_s13  ;;  %s671_s19 = sld [smem:[#allocation2 + $0x2a]] }
  0x66   :  { %v374_v37 = vsel %vm370_vm14, %v373_v36, %v366_v33  ;;  %v375_v38 = vsel %vm371_vm15, %v373_v36, %v367_v34  ;;  %v377_v39 = vstv %s666_s14  ;;  %s672_s20 = sld [smem:[#allocation6 + $0x2a]] }
  0x67   :  { %vm378_vm0 = vcmp.gt.f32.partialorder %v831_v4, %v377_v39  ;;  %vm379_vm1 = vcmp.gt.f32.partialorder %v833_v5, %v377_v39  ;;  %v381_v40 = vstv %s667_s15  ;;  %s673_s21 = sld [smem:[#allocation2 + $0x2b]] }
  0x68   :  { %v382_v41 = vsel %vm378_vm0, %v381_v40, %v374_v37  ;;  %v383_v42 = vsel %vm379_vm1, %v381_v40, %v375_v38  ;;  %v385_v43 = vstv %s668_s16  ;;  %s674_s22 = sld [smem:[#allocation6 + $0x2b]] }
  0x69   :  { %vm386_vm2 = vcmp.gt.f32.partialorder %v831_v4, %v385_v43  ;;  %vm387_vm3 = vcmp.gt.f32.partialorder %v833_v5, %v385_v43  ;;  %v389_v44 = vstv %s669_s17  ;;  %s675_s23 = sld [smem:[#allocation2 + $0x2c]] }
  0x6a   :  { %v390_v45 = vsel %vm386_vm2, %v389_v44, %v382_v41  ;;  %v391_v46 = vsel %vm387_vm3, %v389_v44, %v383_v42  ;;  %v393_v47 = vstv %s670_s18  ;;  %s676_s24 = sld [smem:[#allocation6 + $0x2c]] }
  0x6b   :  { %vm394_vm4 = vcmp.gt.f32.partialorder %v831_v4, %v393_v47  ;;  %vm395_vm5 = vcmp.gt.f32.partialorder %v833_v5, %v393_v47  ;;  %v397_v48 = vstv %s671_s19  ;;  %s677_s0 = sld [smem:[#allocation2 + $0x2d]] }
  0x6c   :  { %v398_v49 = vsel %vm394_vm4, %v397_v48, %v390_v45  ;;  %v399_v50 = vsel %vm395_vm5, %v397_v48, %v391_v46  ;;  %v401_v51 = vstv %s672_s20  ;;  %s678_s1 = sld [smem:[#allocation6 + $0x2d]] }
  0x6d   :  { %vm402_vm6 = vcmp.gt.f32.partialorder %v831_v4, %v401_v51  ;;  %vm403_vm7 = vcmp.gt.f32.partialorder %v833_v5, %v401_v51  ;;  %v405_v52 = vstv %s673_s21  ;;  %s679_s2 = sld [smem:[#allocation2 + $0x2e]] }
  0x6e   :  { %v406_v53 = vsel %vm402_vm6, %v405_v52, %v398_v49  ;;  %v407_v54 = vsel %vm403_vm7, %v405_v52, %v399_v50  ;;  %v409_v55 = vstv %s674_s22  ;;  %s680_s25 = sld [smem:[#allocation6 + $0x2e]] }
  0x6f   :  { %vm410_vm8 = vcmp.gt.f32.partialorder %v831_v4, %v409_v55  ;;  %vm411_vm9 = vcmp.gt.f32.partialorder %v833_v5, %v409_v55  ;;  %v413_v56 = vstv %s675_s23  ;;  %s681_s26 = sld [smem:[#allocation2 + $0x2f]] }
  0x70   :  { %v414_v57 = vsel %vm410_vm8, %v413_v56, %v406_v53  ;;  %v415_v58 = vsel %vm411_vm9, %v413_v56, %v407_v54  ;;  %v417_v59 = vstv %s676_s24  ;;  %s682_s27 = sld [smem:[#allocation6 + $0x2f]] }
  0x71   :  { %vm418_vm10 = vcmp.gt.f32.partialorder %v831_v4, %v417_v59  ;;  %vm419_vm11 = vcmp.gt.f32.partialorder %v833_v5, %v417_v59  ;;  %v421_v60 = vstv %s677_s0  ;;  %s683_s28 = sld [smem:[#allocation2 + $0x30]] }
  0x72   :  { %v422_v61 = vsel %vm418_vm10, %v421_v60, %v414_v57  ;;  %v423_v62 = vsel %vm419_vm11, %v421_v60, %v415_v58  ;;  %v425_v63 = vstv %s678_s1  ;;  %s684_s29 = sld [smem:[#allocation6 + $0x30]] }
  0x73   :  { %vm426_vm12 = vcmp.gt.f32.partialorder %v831_v4, %v425_v63  ;;  %vm427_vm13 = vcmp.gt.f32.partialorder %v833_v5, %v425_v63  ;;  %v429_v0 = vstv %s679_s2  ;;  %s685_s30 = sld [smem:[#allocation2 + $0x31]] }
  0x74   :  { %v430_v1 = vsel %vm426_vm12, %v429_v0, %v422_v61  ;;  %v431_v2 = vsel %vm427_vm13, %v429_v0, %v423_v62  ;;  %v433_v3 = vstv %s680_s25  ;;  %s686_s4 = sld [smem:[#allocation6 + $0x31]] }
  0x75   :  { %vm434_vm14 = vcmp.gt.f32.partialorder %v831_v4, %v433_v3  ;;  %vm435_vm15 = vcmp.gt.f32.partialorder %v833_v5, %v433_v3  ;;  %v437_v6 = vstv %s681_s26  ;;  %s687_s5 = sld [smem:[#allocation2 + $0x32]] }
  0x76   :  { %v438_v7 = vsel %vm434_vm14, %v437_v6, %v430_v1  ;;  %v439_v8 = vsel %vm435_vm15, %v437_v6, %v431_v2  ;;  %v441_v9 = vstv %s682_s27  ;;  %s688_s6 = sld [smem:[#allocation6 + $0x32]] }
  0x77   :  { %vm442_vm0 = vcmp.gt.f32.partialorder %v831_v4, %v441_v9  ;;  %vm443_vm1 = vcmp.gt.f32.partialorder %v833_v5, %v441_v9  ;;  %v445_v10 = vstv %s683_s28  ;;  %s689_s7 = sld [smem:[#allocation2 + $0x33]] }
  0x78   :  { %v446_v11 = vsel %vm442_vm0, %v445_v10, %v438_v7  ;;  %v447_v12 = vsel %vm443_vm1, %v445_v10, %v439_v8  ;;  %v449_v13 = vstv %s684_s29  ;;  %s690_s8 = sld [smem:[#allocation6 + $0x33]]  ;;  %s801_s29 = smov [#allocation9]  }
  0x79   :  { %vm450_vm2 = vcmp.gt.f32.partialorder %v831_v4, %v449_v13  ;;  %vm451_vm3 = vcmp.gt.f32.partialorder %v833_v5, %v449_v13  ;;  %v453_v14 = vstv %s685_s30  ;;  %s691_s9 = sld [smem:[#allocation2 + $0x34]]  ;;  %s575_s30 = sshll.u32 %s801_s29, 4  ;;  %s576_s30 = int_to_ptr.vmem [resolvable:$true] %s575_s30 }
  0x7a   :  { %v454_v15 = vsel %vm450_vm2, %v453_v14, %v446_v11  ;;  %v455_v16 = vsel %vm451_vm3, %v453_v14, %v447_v12  ;;  %v457_v17 = vstv %s686_s4  ;;  %s692_s10 = sld [smem:[#allocation6 + $0x34]] }
  0x7b   :  { %vm458_vm4 = vcmp.gt.f32.partialorder %v831_v4, %v457_v17  ;;  %vm459_vm5 = vcmp.gt.f32.partialorder %v833_v5, %v457_v17  ;;  %v461_v18 = vstv %s687_s5  ;;  %s693_s11 = sld [smem:[#allocation2 + $0x35]] }
  0x7c   :  { %v462_v19 = vsel %vm458_vm4, %v461_v18, %v454_v15  ;;  %v463_v20 = vsel %vm459_vm5, %v461_v18, %v455_v16  ;;  %v465_v21 = vstv %s688_s6  ;;  %s694_s12 = sld [smem:[#allocation6 + $0x35]]  ;;  %s577_s6 = sshll.u32 %s967_s3, 4  ;;  %s578_s6 = int_to_ptr.hbm [resolvable:$true] %s577_s6 }
  0x7d   :  { %vm466_vm6 = vcmp.gt.f32.partialorder %v831_v4, %v465_v21  ;;  %vm467_vm7 = vcmp.gt.f32.partialorder %v833_v5, %v465_v21  ;;  %v469_v22 = vstv %s689_s7  ;;  %s695_s13 = sld [smem:[#allocation2 + $0x36]] }
  0x7e   :  { %v470_v23 = vsel %vm466_vm6, %v469_v22, %v462_v19  ;;  %v471_v24 = vsel %vm467_vm7, %v469_v22, %v463_v20  ;;  %v473_v25 = vstv %s690_s8  ;;  %s696_s14 = sld [smem:[#allocation6 + $0x36]] }
  0x7f   :  { %vm474_vm8 = vcmp.gt.f32.partialorder %v831_v4, %v473_v25  ;;  %vm475_vm9 = vcmp.gt.f32.partialorder %v833_v5, %v473_v25  ;;  %v477_v26 = vstv %s691_s9  ;;  %s697_s15 = sld [smem:[#allocation2 + $0x37]] }
  0x80   :  { %v478_v27 = vsel %vm474_vm8, %v477_v26, %v470_v23  ;;  %v479_v28 = vsel %vm475_vm9, %v477_v26, %v471_v24  ;;  %v481_v29 = vstv %s692_s10  ;;  %s698_s16 = sld [smem:[#allocation6 + $0x37]] }
  0x81   :  { %vm482_vm10 = vcmp.gt.f32.partialorder %v831_v4, %v481_v29  ;;  %vm483_vm11 = vcmp.gt.f32.partialorder %v833_v5, %v481_v29  ;;  %v485_v30 = vstv %s693_s11  ;;  %s699_s17 = sld [smem:[#allocation2 + $0x38]] }
  0x82   :  { %v486_v31 = vsel %vm482_vm10, %v485_v30, %v478_v27  ;;  %v487_v32 = vsel %vm483_vm11, %v485_v30, %v479_v28  ;;  %v489_v33 = vstv %s694_s12  ;;  %s700_s18 = sld [smem:[#allocation6 + $0x38]] }
  0x83   :  { %vm490_vm12 = vcmp.gt.f32.partialorder %v831_v4, %v489_v33  ;;  %vm491_vm13 = vcmp.gt.f32.partialorder %v833_v5, %v489_v33  ;;  %v493_v34 = vstv %s695_s13  ;;  %s701_s19 = sld [smem:[#allocation2 + $0x39]] }
  0x84   :  { %v494_v35 = vsel %vm490_vm12, %v493_v34, %v486_v31  ;;  %v495_v36 = vsel %vm491_vm13, %v493_v34, %v487_v32  ;;  %v497_v37 = vstv %s696_s14  ;;  %s702_s20 = sld [smem:[#allocation6 + $0x39]] }
  0x85   :  { %vm498_vm14 = vcmp.gt.f32.partialorder %v831_v4, %v497_v37  ;;  %vm499_vm15 = vcmp.gt.f32.partialorder %v833_v5, %v497_v37  ;;  %v501_v38 = vstv %s697_s15  ;;  %s703_s21 = sld [smem:[#allocation2 + $0x3a]] }
  0x86   :  { %v502_v39 = vsel %vm498_vm14, %v501_v38, %v494_v35  ;;  %v503_v40 = vsel %vm499_vm15, %v501_v38, %v495_v36  ;;  %v505_v41 = vstv %s698_s16  ;;  %s704_s22 = sld [smem:[#allocation6 + $0x3a]] }
  0x87   :  { %vm506_vm0 = vcmp.gt.f32.partialorder %v831_v4, %v505_v41  ;;  %vm507_vm1 = vcmp.gt.f32.partialorder %v833_v5, %v505_v41  ;;  %v509_v42 = vstv %s699_s17  ;;  %s705_s23 = sld [smem:[#allocation2 + $0x3b]] }
  0x88   :  { %v510_v43 = vsel %vm506_vm0, %v509_v42, %v502_v39  ;;  %v511_v44 = vsel %vm507_vm1, %v509_v42, %v503_v40  ;;  %v513_v45 = vstv %s700_s18  ;;  %s706_s24 = sld [smem:[#allocation6 + $0x3b]] }
  0x89   :  { %vm514_vm2 = vcmp.gt.f32.partialorder %v831_v4, %v513_v45  ;;  %vm515_vm3 = vcmp.gt.f32.partialorder %v833_v5, %v513_v45  ;;  %v517_v46 = vstv %s701_s19  ;;  %s707_s0 = sld [smem:[#allocation2 + $0x3c]] }
  0x8a   :  { %v518_v47 = vsel %vm514_vm2, %v517_v46, %v510_v43  ;;  %v519_v48 = vsel %vm515_vm3, %v517_v46, %v511_v44  ;;  %v521_v49 = vstv %s702_s20  ;;  %s708_s1 = sld [smem:[#allocation6 + $0x3c]] }
  0x8b   :  { %vm522_vm4 = vcmp.gt.f32.partialorder %v831_v4, %v521_v49  ;;  %vm523_vm5 = vcmp.gt.f32.partialorder %v833_v5, %v521_v49  ;;  %v525_v50 = vstv %s703_s21  ;;  %s709_s2 = sld [smem:[#allocation2 + $0x3d]] }
  0x8c   :  { %v526_v51 = vsel %vm522_vm4, %v525_v50, %v518_v47  ;;  %v527_v52 = vsel %vm523_vm5, %v525_v50, %v519_v48  ;;  %v529_v53 = vstv %s704_s22  ;;  %s710_s25 = sld [smem:[#allocation6 + $0x3d]] }
  0x8d   :  { %vm530_vm6 = vcmp.gt.f32.partialorder %v831_v4, %v529_v53  ;;  %vm531_vm7 = vcmp.gt.f32.partialorder %v833_v5, %v529_v53  ;;  %v533_v54 = vstv %s705_s23  ;;  %s711_s26 = sld [smem:[#allocation2 + $0x3e]] }
  0x8e   :  { %v534_v55 = vsel %vm530_vm6, %v533_v54, %v526_v51  ;;  %v535_v56 = vsel %vm531_vm7, %v533_v54, %v527_v52  ;;  %v537_v57 = vstv %s706_s24  ;;  %s712_s27 = sld [smem:[#allocation6 + $0x3e]] }
  0x8f   :  { %vm538_vm8 = vcmp.gt.f32.partialorder %v831_v4, %v537_v57  ;;  %vm539_vm9 = vcmp.gt.f32.partialorder %v833_v5, %v537_v57  ;;  %v541_v58 = vstv %s707_s0  ;;  %s713_s28 = sld [smem:[#allocation2 + $0x3f]] }
  0x90   :  { %v542_v59 = vsel %vm538_vm8, %v541_v58, %v534_v55  ;;  %v543_v60 = vsel %vm539_vm9, %v541_v58, %v535_v56  ;;  %v545_v61 = vstv %s708_s1 }
  0x91   :  { %vm546_vm10 = vcmp.gt.f32.partialorder %v831_v4, %v545_v61  ;;  %vm547_vm11 = vcmp.gt.f32.partialorder %v833_v5, %v545_v61  ;;  %v549_v62 = vstv %s709_s2 }
  0x92   :  { %v550_v63 = vsel %vm546_vm10, %v549_v62, %v542_v59  ;;  %v551_v0 = vsel %vm547_vm11, %v549_v62, %v543_v60  ;;  %v553_v1 = vstv %s710_s25 }
  0x93   :  { %vm554_vm12 = vcmp.gt.f32.partialorder %v831_v4, %v553_v1  ;;  %vm555_vm13 = vcmp.gt.f32.partialorder %v833_v5, %v553_v1  ;;  %v557_v2 = vstv %s711_s26 }
  0x94   :  { %v558_v3 = vsel %vm554_vm12, %v557_v2, %v550_v63  ;;  %v559_v6 = vsel %vm555_vm13, %v557_v2, %v551_v0  ;;  %v561_v7 = vstv %s712_s27 }
  0x95   :  { %vm562_vm14 = vcmp.gt.f32.partialorder %v831_v4, %v561_v7  ;;  %vm563_vm15 = vcmp.gt.f32.partialorder %v833_v5, %v561_v7  ;;  %v565_v8 = vstv %s713_s28 }
  0x96   :  { %v566_v9 = vsel %vm562_vm14, %v565_v8, %v558_v3  ;;  %v567_v10 = vsel %vm563_vm15, %v565_v8, %v559_v6 }
  0x97   :  { %568 = vst [vmem:[#allocation9] sm:$0xff] %v566_v9 }
  0x98   :  { %569 = vst [vmem:[#allocation9 + $0x8] sm:$0xff] %v567_v10 }
  0x99   :  { %580 = dma.vmem_to_hbm [thread:$0]  %s576_s30, 256, %s578_s6, [#allocation4]  }
  0x9a   :  { %796 = dma.done.wait [#allocation4], 256  }
  0x9b   :  { %797 = vsyncadd [#allocation4], 4294967040 }
  0x9c   :  { %585 = vsyncpa [#allocation3], 1 }
  0x9d   :  { %586 = vsyncpa [#allocation4], 1 }
  0x9e   :  { %587 = vsyncpa [#allocation5], 1 }
  0x9f   :  { %588 = vsyncpa [#allocation7], 1 }

</bundles_post_ra>
